<compile_context>
chip_gen: v7x
topology: tpu7x:2x2x1
jax: 0.10.0
libtpu: 0.0.40
codegen_flags: <defaults>
</compile_context>

<pallas_src>
from functools import lru_cache, partial

import jax
import jax.numpy as jnp
from jax.experimental import pallas as pl
from jax.experimental.pallas import tpu as pltpu

EPS = 1e-5
MOMENTUM = 0.9


# ---------------------------------------------------------------------------
# Generation-aware VMEM budgets
# ---------------------------------------------------------------------------
@lru_cache(maxsize=1)
def _vmem_budgets():
    """Returns (per-block byte budget, requested scoped vmem_limit_bytes)."""
    cap = 64 << 20  # conservative fallback (v7x-sized)
    try:
        cap = int(pltpu.get_tpu_info().vmem_capacity_bytes)
    except Exception:
        pass
    if cap >= (100 << 20):        # v5e / v6e: 128 MiB physical VMEM
        return 6 << 20, 80 << 20
    return 3 << 20, 48 << 20      # v7x (64 MiB per TC) or unknown


# ---------------------------------------------------------------------------
# Tile-size helpers
# ---------------------------------------------------------------------------
def _pick_lane_tile(hw, c, itemsize, budget):
    """Lane (HW) tile: full HW if it fits, else a multiple of 128 in budget."""
    if hw * c * itemsize <= budget:
        return hw
    max_elems = max(128, budget // (itemsize * c))
    t = max(128, (max_elems // 128) * 128)
    t = min(t, ((hw + 127) // 128) * 128)
    # Prefer an exact divisor (avoids tail masking) if one exists >= t/2.
    cand = (t // 128) * 128
    while cand >= max(128, t // 2):
        if hw % cand == 0:
            return cand
        cand -= 128
    return t


def _pick_row_tile(n, c, itemsize, budget):
    """Row tile for (rows, C) blocks: full N if it fits, else multiple of 8."""
    if n * c * itemsize <= budget:
        return n
    rows = max(8, (budget // (itemsize * c)) // 8 * 8)
    t = min(n, rows)
    cand = (t // 8) * 8
    while cand >= max(8, t // 2):
        if n % cand == 0:
            return cand
        cand -= 8
    return max(t, 1)


# ---------------------------------------------------------------------------
# Pallas kernels
# ---------------------------------------------------------------------------
def _sums4d_kernel(x_ref, s_ref, s2_ref, acc_s, acc_s2, *, hw, thw):
    """Accumulate per-channel sum / sumsq over (C', thw) tiles.

    Steady state is pure VPU adds into block-sized VMEM scratch; the single
    cross-lane reduce and the (C',1) store happen only in the last-step
    finalize. Outputs are RAW sums (finalized in the jit epilogue).
    """
    n = pl.program_id(1)
    h = pl.program_id(2)

    @pl.when((n == 0) & (h == 0))
    def _init():
        acc_s[...] = jnp.zeros_like(acc_s)
        acc_s2[...] = jnp.zeros_like(acc_s2)

    x = x_ref[...].astype(jnp.float32)                      # (C', thw)
    if hw % thw != 0:                                       # partial tail tile
        rem = hw - h * thw
        mask = jax.lax.broadcasted_iota(jnp.int32, x.shape, 1) < rem
        x = jnp.where(mask, x, 0.0)

    acc_s[...] += x
    acc_s2[...] += x * x

    @pl.when((n == pl.num_programs(1) - 1) & (h == pl.num_programs(2) - 1))
    def _finalize():
        s_ref[...] = jnp.sum(acc_s[...], axis=-1, keepdims=True)
        s2_ref[...] = jnp.sum(acc_s2[...], axis=-1, keepdims=True)


def _norm4d_kernel(x_ref, ss_ref, y_ref):
    """y = x * scale[c] + shift[c] on a (C', thw) tile; ss_ref is (2, C', 1)."""
    x = x_ref[...].astype(jnp.float32)
    y = x * ss_ref[0] + ss_ref[1]
    y_ref[...] = y.astype(y_ref.dtype)


def _sums2d_kernel(x_ref, s_ref, s2_ref, acc_s, acc_s2, *, n_rows, tr):
    """Accumulate per-feature sum / sumsq over (tr, C') row tiles (raw sums)."""
    i = pl.program_id(0)

    @pl.when(i == 0)
    def _init():
        acc_s[...] = jnp.zeros_like(acc_s)
        acc_s2[...] = jnp.zeros_like(acc_s2)

    x = x_ref[...].astype(jnp.float32)                      # (tr, C')
    if n_rows % tr != 0:                                    # partial tail tile
        rem = n_rows - i * tr
        mask = jax.lax.broadcasted_iota(jnp.int32, x.shape, 0) < rem
        x = jnp.where(mask, x, 0.0)

    acc_s[...] += x
    acc_s2[...] += x * x

    @pl.when(i == pl.num_programs(0) - 1)
    def _finalize():
        s_ref[...] = jnp.sum(acc_s[...], axis=0, keepdims=True)
        s2_ref[...] = jnp.sum(acc_s2[...], axis=0, keepdims=True)


def _norm2d_kernel(x_ref, ss_ref, y_ref):
    """y = x * scale + shift on a (tr, C') tile; ss_ref is (2, C')."""
    x = x_ref[...].astype(jnp.float32)
    y = x * ss_ref[0:1, :] + ss_ref[1:2, :]
    y_ref[...] = y.astype(y_ref.dtype)


# ---------------------------------------------------------------------------
# pallas_call wrappers
# ---------------------------------------------------------------------------
def _compute_sums_4d(x3):
    """x3: (N', C', HW) -> raw per-channel (sum, sumsq), each (P, C', 1)."""
    Np, Cp, HW = x3.shape
    budget, vmem_limit = _vmem_budgets()
    thw = _pick_lane_tile(HW, Cp, x3.dtype.itemsize, budget)
    nhw = pl.cdiv(HW, thw)
    P = 2 if (Np >= 2 and Np % 2 == 0) else 1   # dual-TC split on v7x
    n_half = Np // P
    kernel = partial(_sums4d_kernel, hw=HW, thw=thw)
    s, s2 = pl.pallas_call(
        kernel,
        out_shape=(jax.ShapeDtypeStruct((P, Cp, 1), jnp.float32),
                   jax.ShapeDtypeStruct((P, Cp, 1), jnp.float32)),
        grid=(P, n_half, nhw),
        in_specs=[pl.BlockSpec((None, Cp, thw),
                               lambda p, n, h: (p * n_half + n, 0, h))],
        out_specs=(pl.BlockSpec((None, Cp, 1), lambda p, n, h: (p, 0, 0)),
                   pl.BlockSpec((None, Cp, 1), lambda p, n, h: (p, 0, 0))),
        scratch_shapes=[pltpu.VMEM((Cp, thw), jnp.float32),
                        pltpu.VMEM((Cp, thw), jnp.float32)],
        compiler_params=pltpu.CompilerParams(
            dimension_semantics=("parallel", "arbitrary", "arbitrary"),
            vmem_limit_bytes=vmem_limit),
    )(x3)
    return s, s2


def _normalize_4d(x3, scale, shift):
    """x3: (N', C', HW); scale/shift: (C', 1) f32. Returns (N', C', HW)."""
    Np, Cp, HW = x3.shape
    budget, vmem_limit = _vmem_budgets()
    thw = _pick_lane_tile(HW, Cp, x3.dtype.itemsize, budget)
    grid = (Np, pl.cdiv(HW, thw))
    ss = jnp.concatenate(
        [scale.reshape(1, Cp, 1), shift.reshape(1, Cp, 1)], axis=0)
    return pl.pallas_call(
        _norm4d_kernel,
        out_shape=jax.ShapeDtypeStruct((Np, Cp, HW), x3.dtype),
        grid=grid,
        in_specs=[pl.BlockSpec((None, Cp, thw), lambda n, h: (n, 0, h)),
                  pl.BlockSpec((2, Cp, 1), lambda n, h: (0, 0, 0))],
        out_specs=pl.BlockSpec((None, Cp, thw), lambda n, h: (n, 0, h)),
        compiler_params=pltpu.CompilerParams(
            dimension_semantics=("parallel", "parallel"),
            vmem_limit_bytes=vmem_limit),
    )(x3, ss)


def _compute_sums_2d(x2):
    """x2: (N', C') -> raw per-feature (sum, sumsq), each (1, C')."""
    Np, Cp = x2.shape
    budget, vmem_limit = _vmem_budgets()
    tr = _pick_row_tile(Np, Cp, x2.dtype.itemsize, budget)
    grid = (pl.cdiv(Np, tr),)
    kernel = partial(_sums2d_kernel, n_rows=Np, tr=tr)
    s, s2 = pl.pallas_call(
        kernel,
        out_shape=(jax.ShapeDtypeStruct((1, Cp), jnp.float32),
                   jax.ShapeDtypeStruct((1, Cp), jnp.float32)),
        grid=grid,
        in_specs=[pl.BlockSpec((tr, Cp), lambda i: (i, 0))],
        out_specs=(pl.BlockSpec((1, Cp), lambda i: (0, 0)),
                   pl.BlockSpec((1, Cp), lambda i: (0, 0))),
        scratch_shapes=[pltpu.VMEM((tr, Cp), jnp.float32),
                        pltpu.VMEM((tr, Cp), jnp.float32)],
        compiler_params=pltpu.CompilerParams(
            dimension_semantics=("arbitrary",),
            vmem_limit_bytes=vmem_limit),
    )(x2)
    return s, s2


def _normalize_2d(x2, scale_r, shift_r):
    """x2: (N', C'); scale/shift: (1, C') f32. Returns (N', C')."""
    Np, Cp = x2.shape
    budget, vmem_limit = _vmem_budgets()
    tr = _pick_row_tile(Np, Cp, x2.dtype.itemsize, budget)
    grid = (pl.cdiv(Np, tr),)
    ss = jnp.concatenate([scale_r.reshape(1, Cp), shift_r.reshape(1, Cp)], 0)
    return pl.pallas_call(
        _norm2d_kernel,
        out_shape=jax.ShapeDtypeStruct((Np, Cp), x2.dtype),
        grid=grid,
        in_specs=[pl.BlockSpec((tr, Cp), lambda i: (i, 0)),
                  pl.BlockSpec((2, Cp), lambda i: (0, 0))],
        out_specs=pl.BlockSpec((tr, Cp), lambda i: (i, 0)),
        compiler_params=pltpu.CompilerParams(
            dimension_semantics=("parallel",),
            vmem_limit_bytes=vmem_limit),
    )(x2, ss)


# ---------------------------------------------------------------------------
# batch_norm function (mirrors the PyTorch free function), fully under jit
# ---------------------------------------------------------------------------
@partial(jax.jit, static_argnames=("eps", "momentum", "grad_enabled"))
def batch_norm(X, gamma, beta, moving_mean, moving_var,
               eps=EPS, momentum=MOMENTUM, grad_enabled=True):
    assert X.ndim in (2, 4)

    if X.ndim == 2:
        N, C = X.shape
        # Lane-dense packing: fold g rows into the lane axis when C < 128.
        g = 1
        if C < 128 and 128 % C == 0:
            g = 128 // C
            while g > 1 and N % g != 0:
                g //= 2
        Xp = X.reshape(N // g, g * C) if g > 1 else X        # free view
        gm = gamma.reshape(1, C).astype(jnp.float32)
        bt = beta.reshape(1, C).astype(jnp.float32)
        if grad_enabled:
            mean = moving_mean.reshape(1, C).astype(jnp.float32)
            var = moving_var.reshape(1, C).astype(jnp.float32)
            new_mm, new_mv = moving_mean, moving_var
        else:
            s, s2 = _compute_sums_2d(Xp)                     # (1, g*C) each
            s_tot = s.reshape(g, C).sum(axis=0)              # fold groups
            s2_tot = s2.reshape(g, C).sum(axis=0)
            inv = 1.0 / float(N)
            mean = (s_tot * inv).reshape(1, C)
            # E[x^2]-E[x]^2 in f32; clamp guards cancellation before rsqrt.
            var = jnp.maximum(s2_tot * inv - (s_tot * inv) ** 2, 0.0).reshape(1, C)
            new_mm = momentum * moving_mean + (1.0 - momentum) * mean.reshape(moving_mean.shape)
            new_mv = momentum * moving_var + (1.0 - momentum) * var.reshape(moving_var.shape)
        scale = gm * jax.lax.rsqrt(var + eps)                # (1, C)
        shift = bt - mean * scale
        scale_p = jnp.tile(scale, (1, g)) if g > 1 else scale
        shift_p = jnp.tile(shift, (1, g)) if g > 1 else shift
        Y = _normalize_2d(Xp, scale_p, shift_p).reshape(N, C)
        return Y, new_mm, new_mv

    # 4-D NCHW: run in the native layout, H*W in the lane dimension.
    N, C, H, W = X.shape
    HW = H * W
    # Sublane packing: fold k images into the channel axis when C < 8.
    k = 1
    if C < 8 and 8 % C == 0:
        k = 8 // C
        while k > 1 and N % k != 0:
            k //= 2
    x3 = X.reshape(N // k, k * C, HW)                        # free view
    gm = gamma.reshape(C, 1).astype(jnp.float32)
    bt = beta.reshape(C, 1).astype(jnp.float32)
    if grad_enabled:
        mean = moving_mean.reshape(C, 1).astype(jnp.float32)
        var = moving_var.reshape(C, 1).astype(jnp.float32)
        new_mm, new_mv = moving_mean, moving_var
    else:
        s, s2 = _compute_sums_4d(x3)                         # (P, k*C, 1) each
        s_tot = s.sum(axis=0).reshape(k, C).sum(axis=0)      # fold cores+groups
        s2_tot = s2.sum(axis=0).reshape(k, C).sum(axis=0)
        inv = 1.0 / float(N * HW)
        mean_c = s_tot * inv
        var_c = jnp.maximum(s2_tot * inv - mean_c ** 2, 0.0)
        mean = mean_c.reshape(C, 1)
        var = var_c.reshape(C, 1)
        new_mm = momentum * moving_mean + (1.0 - momentum) * mean.reshape(moving_mean.shape)
        new_mv = momentum * moving_var + (1.0 - momentum) * var.reshape(moving_var.shape)
    scale = gm * jax.lax.rsqrt(var + eps)                    # (C, 1)
    shift = bt - mean * scale
    scale_p = jnp.tile(scale, (k, 1)) if k > 1 else scale
    shift_p = jnp.tile(shift, (k, 1)) if k > 1 else shift
    Y = _normalize_4d(x3, scale_p, shift_p).reshape(N, C, H, W)
    return Y, new_mm, new_mv


# ---------------------------------------------------------------------------
# Module-like wrapper (parameters initialized as in the PyTorch __init__)
# ---------------------------------------------------------------------------
class BatchNorm:
    def __init__(self, num_features, num_dims):
        shape = (1, num_features) if num_dims == 2 else (1, num_features, 1, 1)
        self.gamma = jnp.ones(shape, jnp.float32)
        self.beta = jnp.zeros(shape, jnp.float32)
        self.moving_mean = jnp.zeros(shape, jnp.float32)
        self.moving_var = jnp.ones(shape, jnp.float32)

    def __call__(self, X, grad_enabled=True):
        Y, self.moving_mean, self.moving_var = batch_norm(
            X, self.gamma, self.beta, self.moving_mean, self.moving_var,
            eps=EPS, momentum=MOMENTUM, grad_enabled=grad_enabled)
        return Y


# ---------------------------------------------------------------------------
# Pure-JAX reference for verification
# ---------------------------------------------------------------------------
def _batch_norm_ref(X, gamma, beta, moving_mean, moving_var, eps, momentum,
                    grad_enabled):
    if grad_enabled:
        X_hat = (X - moving_mean) / jnp.sqrt(moving_var + eps)
        mm, mv = moving_mean, moving_var
    else:
        if X.ndim == 2:
            mean = X.mean(axis=0)
            var = ((X - mean) ** 2).mean(axis=0)
        else:
            mean = X.mean(axis=(0, 2, 3), keepdims=True)
            var = ((X - mean) ** 2).mean(axis=(0, 2, 3), keepdims=True)
        X_hat = (X - mean) / jnp.sqrt(var + eps)
        mm = momentum * moving_mean + (1.0 - momentum) * mean
        mv = momentum * moving_var + (1.0 - momentum) * var
    return gamma * X_hat + beta, mm, mv


if __name__ == "__main__":
    key = jax.random.PRNGKey(0)
    k4, k2 = jax.random.split(key)

    # ---- 4-D case: NCHW, num_dims=4 ----
    x4 = jax.random.normal(k4, (2, 4, 16, 16), dtype=jnp.float32) * 2.0 + 0.5
    bn4 = BatchNorm(num_features=4, num_dims=4)

    # default forward (grad enabled in PyTorch -> moving-stat normalization)
    y4_infer = bn4(x4, grad_enabled=True)
    # no_grad-style forward (batch statistics + moving-average update)
    y4_train = bn4(x4, grad_enabled=False)
    jax.block_until_ready((y4_infer, y4_train, bn4.moving_mean, bn4.moving_var))

    # references
    g4 = jnp.ones((1, 4, 1, 1), jnp.float32)
    b4 = jnp.zeros((1, 4, 1, 1), jnp.float32)
    mm0 = jnp.zeros((1, 4, 1, 1), jnp.float32)
    mv0 = jnp.ones((1, 4, 1, 1), jnp.float32)
    r4_infer, _, _ = _batch_norm_ref(x4, g4, b4, mm0, mv0, EPS, MOMENTUM, True)
    r4_train, rmm, rmv = _batch_norm_ref(x4, g4, b4, mm0, mv0, EPS, MOMENTUM, False)

    assert jnp.allclose(y4_infer, r4_infer, atol=1e-4)
    assert jnp.allclose(y4_train, r4_train, atol=1e-4)
    assert jnp.allclose(bn4.moving_mean, rmm, atol=1e-5)
    assert jnp.allclose(bn4.moving_var, rmv, atol=1e-5)

    # ---- 2-D case: (N, features), num_dims=2 ----
    x2 = jax.random.normal(k2, (8, 32), dtype=jnp.float32) - 1.0
    bn2 = BatchNorm(num_features=32, num_dims=2)
    y2_train = bn2(x2, grad_enabled=False)
    jax.block_until_ready((y2_train, bn2.moving_mean, bn2.moving_var))

    g2 = jnp.ones((1, 32), jnp.float32)
    b2 = jnp.zeros((1, 32), jnp.float32)
    r2_train, rmm2, rmv2 = _batch_norm_ref(
        x2, g2, b2, jnp.zeros((1, 32)), jnp.ones((1, 32)), EPS, MOMENTUM, False)
    assert jnp.allclose(y2_train, r2_train, atol=1e-4)
    assert jnp.allclose(bn2.moving_mean, rmm2, atol=1e-5)
    assert jnp.allclose(bn2.moving_var, rmv2, atol=1e-5)

    print("KERNEL_OK")
</pallas_src>

<mosaic_0001>
module attributes {stable_mosaic.version = 11 : i64} {
  func.func @_norm4d_kernel(%arg0: i32, %arg1: i32, %arg2: memref<1x8x256xf32, #tpu.memory_space<vmem>>, %arg3: memref<2x8x1xf32, #tpu.memory_space<vmem>>, %arg4: memref<1x8x256xf32, #tpu.memory_space<vmem>>) attributes {dimension_semantics = [#tpu.dimension_semantics<parallel>, #tpu.dimension_semantics<parallel>], iteration_bounds = array<i64: 1, 1>, scalar_prefetch = 0 : i64, scratch_operands = 0 : i64, tpu.core_type = #tpu.core_type<tc>, window_params = [{transform_indices = @transform_0, window_bounds = array<i64: 1, 8, 256>}, {pipeline_mode = #tpu.pipeline_mode<synchronous>, transform_indices = @transform_1, window_bounds = array<i64: 2, 8, 1>}, {transform_indices = @transform_2, window_bounds = array<i64: 1, 8, 256>}]} {
    %c0 = arith.constant 0 : index
    %c0_0 = arith.constant 0 : index
    %c0_1 = arith.constant 0 : index
    %0 = vector.load %arg2[%c0, %c0_0, %c0_1] : memref<1x8x256xf32, #tpu.memory_space<vmem>>, vector<1x8x256xf32>
    %1 = vector.shape_cast %0 : vector<1x8x256xf32> to vector<8x256xf32>
    %c0_2 = arith.constant 0 : index
    %c0_3 = arith.constant 0 : index
    %c0_4 = arith.constant 0 : index
    %2 = vector.load %arg3[%c0_2, %c0_3, %c0_4] : memref<2x8x1xf32, #tpu.memory_space<vmem>>, vector<1x8x1xf32>
    %3 = vector.shape_cast %2 : vector<1x8x1xf32> to vector<8x1xf32>
    %4 = vector.broadcast %3 : vector<8x1xf32> to vector<8x256xf32>
    %5 = arith.mulf %1, %4 : vector<8x256xf32>
    %c1 = arith.constant 1 : index
    %c0_5 = arith.constant 0 : index
    %c0_6 = arith.constant 0 : index
    %6 = vector.load %arg3[%c1, %c0_5, %c0_6] : memref<2x8x1xf32, #tpu.memory_space<vmem>>, vector<1x8x1xf32>
    %7 = vector.shape_cast %6 : vector<1x8x1xf32> to vector<8x1xf32>
    %8 = vector.broadcast %7 : vector<8x1xf32> to vector<8x256xf32>
    %9 = arith.addf %5, %8 : vector<8x256xf32>
    %c0_7 = arith.constant 0 : index
    %c0_8 = arith.constant 0 : index
    %c0_9 = arith.constant 0 : index
    %10 = vector.load %arg4[%c0_7, %c0_8, %c0_9] : memref<1x8x256xf32, #tpu.memory_space<vmem>>, vector<1x8x256xf32>
    %11 = vector.shape_cast %10 : vector<1x8x256xf32> to vector<8x256xf32>
    %12 = vector.shape_cast %9 : vector<8x256xf32> to vector<1x8x256xf32>
    tpu.vector_store %arg4[%c0_7, %c0_8, %c0_9], %12 {strides = array<i32>} : memref<1x8x256xf32, #tpu.memory_space<vmem>>, vector<1x8x256xf32>,
    return
  }
  func.func @transform_0(%arg0: i32, %arg1: i32) -> (i32, i32, i32) {
    %c0_i32 = arith.constant 0 : i32
    %c0_i32_0 = arith.constant 0 : i32
    return %arg0, %c0_i32, %arg1 : i32, i32, i32
  }
  func.func @transform_1(%arg0: i32, %arg1: i32) -> (i32, i32, i32) {
    %c0_i32 = arith.constant 0 : i32
    %c0_i32_0 = arith.constant 0 : i32
    %c0_i32_1 = arith.constant 0 : i32
    %c0_i32_2 = arith.constant 0 : i32
    return %c0_i32, %c0_i32_0, %c0_i32_1 : i32, i32, i32
  }
  func.func @transform_2(%arg0: i32, %arg1: i32) -> (i32, i32, i32) {
    %c0_i32 = arith.constant 0 : i32
    %c0_i32_0 = arith.constant 0 : i32
    return %arg0, %c0_i32, %arg1 : i32, i32, i32
  }
}

</mosaic_0001>

<bundles_post_ra>
// kernel: batch_norm.1
= control target key start
LH: loop header
LB: loop body
LE: loop exit
PB: predicated region body
PF: predicated region fallthrough
CT: control target
= control target key end

     0   :  { %v39_v0 = vmov 0   ;;  %s73_s1 = inlined_call_operand.vmem [shape: f32[2,8,1], index: 1, kind: input, shape index: {}]   ;;  %s74_s0 = inlined_call_operand.vmem [shape: f32[1,8,256], index: 0, kind: input, shape index: {}]   ;;  %s75_s2 = inlined_call_operand.vmem [shape: f32[1,8,256], index: 2, kind: output, shape index: {}]  }
   0x1   :  { %38 = vset.pattern.permute.xlu0 %v39_v0  ;;  %v13_v1 = vld [vmem:[%s73_s1] sm:$0xff]  ;;  %v36_v2 = vld [vmem:[%s73_s1 + $0x8] sm:$0xff] }
   0x2   :  { %16 = vperm.xlu0 %38, %v13_v1   ;;  %v11_v4 = vld [vmem:[%s74_s0] sm:$0xff]  ;;  %v12_v5 = vld [vmem:[%s74_s0 + $0x8] sm:$0xff] }
   0x6   :  { %25 = vperm.xlu0 %38, %v36_v2  }
  0x81   :  { %v17_v3 = vpop.permute.xlu0 %16 }
  0x82   :  { %v19_v6 = vmul.f32 %v17_v3, %v11_v4  ;;  %v20_v7 = vmul.f32 %v17_v3, %v12_v5 }
  0x85   :  { %v26_v8 = vpop.permute.xlu0 %25 }
  0x86   :  { %v28_v9 = vadd.f32 %v26_v8, %v19_v6  ;;  %v29_v10 = vadd.f32 %v26_v8, %v20_v7 }
  0x88   :  { %30 = vst [vmem:[%s75_s2] sm:$0xff] %v28_v9  ;;  %31 = vst [vmem:[%s75_s2 + $0x8] sm:$0xff] %v29_v10 }

</bundles_post_ra>
